<compile_context>
chip_gen: v7x
topology: tpu7x:2x2x1
jax: 0.10.0
libtpu: 0.0.40
codegen_flags: <defaults>
</compile_context>

<pallas_src>
import jax
import jax.numpy as jnp
from jax.experimental import pallas as pl
from jax.experimental.pallas import tpu as pltpu


# ----------------------------------------------------------------------------
# Pallas kernel: elementwise func(x) on a (block_rows, lane_width) VMEM tile.
# ----------------------------------------------------------------------------
def _lambda_kernel(x_ref, o_ref):
    # func(x) == torch.sigmoid(x); exp lowers to the EUP transcendental unit,
    # so this kernel is purely HBM-bandwidth-bound.
    o_ref[...] = jax.nn.sigmoid(x_ref[...])


def lambda_forward(x: jax.Array, *, target_block_bytes: int = 2 * 1024 * 1024) -> jax.Array:
    """Apply the Lambda layer's func elementwise via a Pallas TPU kernel.

    x: any-shaped float array (NCHW in the ComDefend usage). Returns an array
    of identical shape/dtype.
    """
    orig_shape = x.shape
    orig_dtype = x.dtype
    total = int(x.size)
    if total == 0:
        return x

    itemsize = jnp.dtype(orig_dtype).itemsize
    # Minimum sublane granule: 8 for 32-bit, 16 for bf16/fp16, 32 for 8-bit.
    granule = max(8, 32 // max(itemsize, 1))

    # Widest lane-dense slab that requires no padding copy; if padding is
    # unavoidable anyway, use a wide (512-lane) slab — the pad is tiny.
    lane_width = None
    for w in (1024, 512, 256, 128):
        if total % (granule * w) == 0:
            lane_width = w
            break
    needs_pad = lane_width is None
    if needs_pad:
        lane_width = 512

    unit = granule * lane_width
    padded_total = ((total + unit - 1) // unit) * unit

    x_flat = x.reshape(-1)
    if needs_pad:
        # TODO(synk): the tail could instead be masked in-kernel to avoid this
        # copy; it only triggers for small / oddly-sized inputs.
        x_flat = jnp.pad(x_flat, (0, padded_total - total))

    rows = padded_total // lane_width  # always a multiple of `granule`
    x2d = x_flat.reshape(rows, lane_width)

    # Block rows: ~target_block_bytes per block (double-buffered in+out stays
    # well under every chip's scoped-VMEM default), but keep >= ~4 grid steps
    # for v7x's two TensorCores, and never drop below the dtype granule.
    cap_rows = max(
        granule,
        (target_block_bytes // (lane_width * itemsize)) // granule * granule,
    )
    min_steps = 4
    rows_for_steps = -(-rows // min_steps)  # ceil-div
    rows_for_steps = ((rows_for_steps + granule - 1) // granule) * granule
    block_rows = max(granule, min(cap_rows, rows_for_steps))

    grid = (pl.cdiv(rows, block_rows),)  # ragged final block handled by Pallas

    out2d = pl.pallas_call(
        _lambda_kernel,
        out_shape=jax.ShapeDtypeStruct((rows, lane_width), orig_dtype),
        grid_spec=pltpu.PrefetchScalarGridSpec(
            num_scalar_prefetch=0,
            grid=grid,
            in_specs=[pl.BlockSpec((block_rows, lane_width), lambda i: (i, 0))],
            out_specs=pl.BlockSpec((block_rows, lane_width), lambda i: (i, 0)),
        ),
        compiler_params=pltpu.CompilerParams(
            dimension_semantics=("parallel",),
        ),
    )(x2d)

    out_flat = out2d.reshape(-1)
    if needs_pad:
        out_flat = out_flat[:total]
    return out_flat.reshape(orig_shape)


# ----------------------------------------------------------------------------
# Demo / correctness check
# ----------------------------------------------------------------------------
if __name__ == "__main__":
    key = jax.random.PRNGKey(0)

    # Small NCHW input consistent with the module's usage: batch=2, C=4, 16x16.
    x = jax.random.normal(key, (2, 4, 16, 16), dtype=jnp.float32)
    y = jax.block_until_ready(lambda_forward(x))
    y_ref = jax.nn.sigmoid(x)
    assert y.shape == x.shape and y.dtype == x.dtype
    assert jnp.allclose(y, y_ref, atol=1e-6, rtol=1e-6)

    # Oddly-sized input exercises the (rare) pad/slice tail path.
    x_odd = jax.random.normal(jax.random.PRNGKey(1), (2, 3, 5, 7), dtype=jnp.float32)
    y_odd = jax.block_until_ready(lambda_forward(x_odd))
    assert y_odd.shape == x_odd.shape
    assert jnp.allclose(y_odd, jax.nn.sigmoid(x_odd), atol=1e-6, rtol=1e-6)

    print("KERNEL_OK")
</pallas_src>

<mosaic_0001>
module attributes {stable_mosaic.version = 11 : i64} {
  func.func @_lambda_kernel(%arg0: i32, %arg1: memref<8x256xf32, #tpu.memory_space<vmem>>, %arg2: memref<8x256xf32, #tpu.memory_space<vmem>>) attributes {dimension_semantics = [#tpu.dimension_semantics<parallel>], iteration_bounds = array<i64: 1>, scalar_prefetch = 0 : i64, scratch_operands = 0 : i64, tpu.core_type = #tpu.core_type<tc>, window_params = [{transform_indices = @transform_0, window_bounds = array<i64: 8, 256>}, {transform_indices = @transform_1, window_bounds = array<i64: 8, 256>}]} {
    %c0 = arith.constant 0 : index
    %c0_0 = arith.constant 0 : index
    %0 = vector.load %arg1[%c0, %c0_0] : memref<8x256xf32, #tpu.memory_space<vmem>>, vector<8x256xf32>
    %1 = arith.negf %0 : vector<8x256xf32>
    %2 = math.exp %1 : vector<8x256xf32>
    %cst = arith.constant 1.000000e+00 : f32
    %3 = vector.broadcast %cst : f32 to vector<8x256xf32>
    %4 = arith.addf %3, %2 : vector<8x256xf32>
    %5 = arith.divf %3, %4 : vector<8x256xf32>
    %c0_1 = arith.constant 0 : index
    %c0_2 = arith.constant 0 : index
    %6 = vector.load %arg2[%c0_1, %c0_2] : memref<8x256xf32, #tpu.memory_space<vmem>>, vector<8x256xf32>
    tpu.vector_store %arg2[%c0_1, %c0_2], %5 {strides = array<i32>} : memref<8x256xf32, #tpu.memory_space<vmem>>, vector<8x256xf32>,
    return
  }
  func.func @transform_0(%arg0: i32) -> (i32, i32) {
    %c0_i32 = arith.constant 0 : i32
    %c0_i32_0 = arith.constant 0 : i32
    return %arg0, %c0_i32 : i32, i32
  }
  func.func @transform_1(%arg0: i32) -> (i32, i32) {
    %c0_i32 = arith.constant 0 : i32
    %c0_i32_0 = arith.constant 0 : i32
    return %arg0, %c0_i32 : i32, i32
  }
}

</mosaic_0001>

<bundles_post_ra>
// kernel: tpu_custom_call.1
= control target key start
LH: loop header
LB: loop body
LE: loop exit
PB: predicated region body
PF: predicated region fallthrough
CT: control target
= control target key end

     0   :  { %6 = vsyncpa [#allocation3], 0  ;;  %s148_s0 = inlined_call_operand.hbm [shape: f32[8,256], index: 0, kind: input, shape index: {}]   ;;  %s149_s1 = inlined_call_operand.hbm [shape: f32[8,256], index: 1, kind: output, shape index: {}]  }
   0x1   :  { %7 = vsyncpa [#allocation4], 0  ;;  %s112_s6 = smov [#allocation2]   ;;  %s64_s10 = scalar_lea.hbm %s148_s0, 256 }
   0x2   :  { %s14_s7 = sshll.u32 %s112_s6, 4  ;;  %p65_p0 = scmp.ne.s32.totalorder %s148_s0, %s64_s10  ;;  %s15_s7 = int_to_ptr.vmem [resolvable:$true] %s14_s7 }
   0x3   :  { %p68_p1 = scmp.lt.u32.totalorder %s64_s10, %s148_s0 }
   0x5   :  { %p70_p2 = pnand %p68_p1, %p65_p0 }
   0x7   :  { %73 = shalt.err (!%p70_p2)
}
   0x8   :  { %s74_s15 = scalar_lea.vmem %s15_s7, 256  ;;  %p79_p4 = scmp.lt.s32.totalorder %s15_s7, %s15_s7 }
   0x9   :  { %p75_p3 = scmp.ne.s32.totalorder %s15_s7, %s74_s15  ;;  %p80_p5 = scmp.lt.s32.totalorder %s74_s15, %s74_s15 }
   0xb   :  { %p81_p6 = por %p80_p5, %p79_p4 }
   0xd   :  { %p82_p7 = pnand %p81_p6, %p75_p3 }
   0xf   :  { %85 = shalt.err (!%p82_p7)
}
  0x10   :  { %17 = dma.hbm_to_vmem [thread:$0]  %s148_s0, 256, %s15_s7, [#allocation3]  }
  0x11   :  { %108 = dma.done.wait [#allocation3], 256  }
  0x12   :  { %109 = vsyncadd [#allocation3], 4294967040  ;;  %v21_v0 = vld [vmem:[#allocation2] sm:$0xff]  ;;  %v22_v1 = vld [vmem:[#allocation2 + $0x8] sm:$0xff]  ;;  %s113_s18 = smov [#allocation5]  }
  0x13   :  { %v52_v2 = vmul.f32 -1.442695, %v21_v0  ;;  %v53_v3 = vmul.f32 -1.442695, %v22_v1  ;;  %s43_s19 = sshll.u32 %s113_s18, 4  ;;  %s44_s19 = int_to_ptr.vmem [resolvable:$true] %s43_s19 }
  0x14   :  { %s86_s0 = scalar_lea.vmem %s44_s19, 256  ;;  %p91_p9 = scmp.lt.s32.totalorder %s44_s19, %s44_s19 }
  0x15   :  { %56 = vpow2.f32 %v52_v2  ;;  %p87_p8 = scmp.ne.s32.totalorder %s44_s19, %s86_s0  ;;  %p92_p10 = scmp.lt.s32.totalorder %s86_s0, %s86_s0 }
  0x16   :  { %58 = vpow2.f32 %v53_v3 }
  0x17   :  { %p93_p11 = por %p92_p10, %p91_p9 }
  0x19   :  { %p94_p12 = pnand %p93_p11, %p87_p8 }
  0x1f   :  { %v57_v4 = vpop.eup %56 }
  0x20   :  { %v59_v5 = vpop.eup %58  ;;  %v29_v6 = vadd.f32 1.0, %v57_v4 }
  0x21   :  { %v30_v7 = vadd.f32 1.0, %v59_v5 }
  0x22   :  { %60 = vrcp.f32 %v29_v6 }
  0x23   :  { %62 = vrcp.f32 %v30_v7 }
  0x2c   :  { %v61_v8 = vpop.eup %60 }
  0x2d   :  { %v63_v9 = vpop.eup %62  ;;  %35 = vst [vmem:[#allocation5] sm:$0xff] %v61_v8 }
  0x2e   :  { %36 = vst [vmem:[#allocation5 + $0x8] sm:$0xff] %v63_v9 }
  0x2f   :  { %97 = shalt.err (!%p94_p12)
}
  0x30   :  { %s98_s22 = scalar_lea.hbm %s149_s1, 256 }
  0x31   :  { %p99_p13 = scmp.ne.s32.totalorder %s149_s1, %s98_s22  ;;  %p102_p0 = scmp.lt.u32.totalorder %s98_s22, %s149_s1 }
  0x33   :  { %p104_p1 = pnand %p102_p0, %p99_p13 }
  0x35   :  { %107 = shalt.err (!%p104_p1)
}
  0x36   :  { %46 = dma.vmem_to_hbm [thread:$0]  %s44_s19, 256, %s149_s1, [#allocation4]  }
  0x37   :  { %110 = dma.done.wait [#allocation4], 256  }
  0x38   :  { %111 = vsyncadd [#allocation4], 4294967040 }
  0x39   :  { %50 = vsyncpa [#allocation3], 1 }
  0x3a   :  { %51 = vsyncpa [#allocation4], 1 }

</bundles_post_ra>
